<compile_context>
chip_gen: v7x
topology: tpu7x:2x2x1
jax: 0.10.0
libtpu: 0.0.40
codegen_flags: <defaults>
</compile_context>

<pallas_src>
import jax
import jax.numpy as jnp
from jax.experimental import pallas as pl
from jax.experimental.pallas import tpu as pltpu

IN_FEATURES = 10 * 10 * 3     # 300
HIDDEN = 84
CLASSES = 3
PADDED_CLASSES = 128          # lane-dense class/output dimension
NEG_BIG = -1e30               # padded-class bias -> exp() underflows to exactly 0
DEFAULT_BATCH_TILE = 512      # rows of x per grid step (multiple of 8)


def _mlp_softmax_kernel(x_ref, w1_ref, b1_ref, w2_ref, b2_ref, o_ref):
    # x: (TB, 300) bf16, w1: (300, 84) bf16, b1: (1, 84) f32,
    # w2: (84, 128) bf16 (zero-padded), b2: (1, 128) f32 (NEG_BIG in padded slots)
    x = x_ref[...]

    # fc1 + ReLU (f32 accumulation on the MXU, f32 elementwise)
    h = jnp.dot(x, w1_ref[...], preferred_element_type=jnp.float32) + b1_ref[...]
    h = jnp.maximum(h, 0.0)

    # fc2 into a dense 128-lane class vreg
    logits = jnp.dot(h.astype(jnp.bfloat16), w2_ref[...],
                     preferred_element_type=jnp.float32) + b2_ref[...]

    # softmax over classes (padded lanes contribute exp(NEG_BIG - m) == 0)
    m = jnp.max(logits, axis=-1, keepdims=True)
    e = jnp.exp(logits - m)
    denom = jnp.sum(e, axis=-1, keepdims=True)
    o_ref[...] = (e * pl.reciprocal(denom, approx=True)).astype(o_ref.dtype)


def mocknet_forward(x_nchw, w1, b1, w2, b2, *, batch_tile=DEFAULT_BATCH_TILE):
    """x_nchw: (B, 3, 10, 10). w1: (84, 300), b1: (84,), w2: (3, 84), b2: (3,).
    Returns (B, 3) softmax probabilities (float32)."""
    B = x_nchw.shape[0]

    # glue: flatten exactly like torch.flatten(x, 1) -> (B, C*H*W) channel-major
    x_flat = x_nchw.reshape(B, -1)
    x_bf16 = x_flat.astype(jnp.bfloat16)

    # pre-transpose weights so the kernel computes x @ W^T as x @ w
    w1_t = w1.T.astype(jnp.bfloat16)                       # (300, 84)
    b1_2d = b1.reshape(1, HIDDEN).astype(jnp.float32)      # (1, 84)

    # pad the class dimension to 128 lanes; padded bias slots get NEG_BIG so
    # their softmax contribution is exactly zero.
    w2_pad = jnp.zeros((HIDDEN, PADDED_CLASSES), jnp.bfloat16)
    w2_pad = w2_pad.at[:, :CLASSES].set(w2.T.astype(jnp.bfloat16))   # (84, 128)
    b2_pad = jnp.full((1, PADDED_CLASSES), NEG_BIG, jnp.float32)
    b2_pad = b2_pad.at[:, :CLASSES].set(b2.astype(jnp.float32))      # (1, 128)

    # batch tile: whole batch if small (block == full dim satisfies layout rule),
    # otherwise a fixed multiple-of-8 tile; pl.cdiv handles a ragged last block.
    tb = B if B <= batch_tile else batch_tile
    grid = (pl.cdiv(B, tb),)

    out_padded = pl.pallas_call(
        _mlp_softmax_kernel,
        out_shape=jax.ShapeDtypeStruct((B, PADDED_CLASSES), jnp.float32),
        grid=grid,
        in_specs=[
            pl.BlockSpec((tb, IN_FEATURES), lambda i: (i, 0)),          # x tiles stream
            pl.BlockSpec((IN_FEATURES, HIDDEN), lambda i: (0, 0)),      # weights resident
            pl.BlockSpec((1, HIDDEN), lambda i: (0, 0)),
            pl.BlockSpec((HIDDEN, PADDED_CLASSES), lambda i: (0, 0)),
            pl.BlockSpec((1, PADDED_CLASSES), lambda i: (0, 0)),
        ],
        out_specs=pl.BlockSpec((tb, PADDED_CLASSES), lambda i: (i, 0)),
        compiler_params=pltpu.CompilerParams(
            dimension_semantics=("parallel",),        # v7x: shard batch over 2 TCs
            vmem_limit_bytes=32 * 1024 * 1024,
        ),
    )(x_bf16, w1_t, b1_2d, w2_pad, b2_pad)

    return out_padded[:, :CLASSES]


def _reference_forward(x_nchw, w1, b1, w2, b2):
    """Plain-JAX f32 reference mirroring the PyTorch module."""
    x = x_nchw.reshape(x_nchw.shape[0], -1).astype(jnp.float32)
    h = jnp.maximum(x @ w1.T + b1, 0.0)
    logits = h @ w2.T + b2
    return jax.nn.softmax(logits, axis=-1)


def init_params(key):
    """Deterministic init mirroring nn.Linear default (uniform +-1/sqrt(fan_in))."""
    k1, k2, k3, k4 = jax.random.split(key, 4)
    bound1 = 1.0 / jnp.sqrt(IN_FEATURES)
    bound2 = 1.0 / jnp.sqrt(HIDDEN)
    w1 = jax.random.uniform(k1, (HIDDEN, IN_FEATURES), jnp.float32, -bound1, bound1)
    b1 = jax.random.uniform(k2, (HIDDEN,), jnp.float32, -bound1, bound1)
    w2 = jax.random.uniform(k3, (CLASSES, HIDDEN), jnp.float32, -bound2, bound2)
    b2 = jax.random.uniform(k4, (CLASSES,), jnp.float32, -bound2, bound2)
    return w1, b1, w2, b2


if __name__ == "__main__":
    key = jax.random.PRNGKey(0)
    kx, kp = jax.random.split(key)
    x = jax.random.normal(kx, (2, 3, 10, 10), jnp.float32)   # NCHW, batch=2
    w1, b1, w2, b2 = init_params(kp)

    out = mocknet_forward(x, w1, b1, w2, b2)
    out = jax.block_until_ready(out)

    # sanity: shape, probabilities sum to 1, and matches the f32 reference
    # within bf16-matmul tolerance.
    assert out.shape == (2, CLASSES)
    assert jnp.allclose(jnp.sum(out, axis=-1), 1.0, atol=1e-2)
    ref = _reference_forward(x, w1, b1, w2, b2)
    assert jnp.allclose(out, ref, atol=3e-2), (out, ref)

    print("KERNEL_OK")
</pallas_src>

<mosaic_0001>
module attributes {stable_mosaic.version = 11 : i64} {
  func.func @_mlp_softmax_kernel(%arg0: i32, %arg1: memref<2x300xbf16, #tpu.memory_space<vmem>>, %arg2: memref<300x84xbf16, #tpu.memory_space<vmem>>, %arg3: memref<1x84xf32, #tpu.memory_space<vmem>>, %arg4: memref<84x128xbf16, #tpu.memory_space<vmem>>, %arg5: memref<1x128xf32, #tpu.memory_space<vmem>>, %arg6: memref<2x128xf32, #tpu.memory_space<vmem>>) attributes {dimension_semantics = [#tpu.dimension_semantics<parallel>], iteration_bounds = array<i64: 1>, scalar_prefetch = 0 : i64, scratch_operands = 0 : i64, tpu.core_type = #tpu.core_type<tc>, window_params = [{transform_indices = @transform_0, window_bounds = array<i64: 2, 300>}, {pipeline_mode = #tpu.pipeline_mode<synchronous>, transform_indices = @transform_1, window_bounds = array<i64: 300, 84>}, {pipeline_mode = #tpu.pipeline_mode<synchronous>, transform_indices = @transform_2, window_bounds = array<i64: 1, 84>}, {pipeline_mode = #tpu.pipeline_mode<synchronous>, transform_indices = @transform_3, window_bounds = array<i64: 84, 128>}, {pipeline_mode = #tpu.pipeline_mode<synchronous>, transform_indices = @transform_4, window_bounds = array<i64: 1, 128>}, {transform_indices = @transform_5, window_bounds = array<i64: 2, 128>}]} {
    %c0 = arith.constant 0 : index
    %c0_0 = arith.constant 0 : index
    %0 = vector.load %arg1[%c0, %c0_0] : memref<2x300xbf16, #tpu.memory_space<vmem>>, vector<2x300xbf16>
    %c0_1 = arith.constant 0 : index
    %c0_2 = arith.constant 0 : index
    %1 = vector.load %arg2[%c0_1, %c0_2] : memref<300x84xbf16, #tpu.memory_space<vmem>>, vector<300x84xbf16>
    %cst = arith.constant dense<0.000000e+00> : vector<2x84xf32>
    %2 = tpu.matmul %0, %1, %cst {dimension_numbers = #tpu.dot_dimension_numbers<[1], [0], [0], [1], [0, 0, 1, 1], [], []>} : vector<2x300xbf16>, vector<300x84xbf16>, vector<2x84xf32> -> vector<2x84xf32>
    %c0_3 = arith.constant 0 : index
    %c0_4 = arith.constant 0 : index
    %3 = vector.load %arg3[%c0_3, %c0_4] : memref<1x84xf32, #tpu.memory_space<vmem>>, vector<1x84xf32>
    %4 = vector.broadcast %3 : vector<1x84xf32> to vector<2x84xf32>
    %5 = arith.addf %2, %4 : vector<2x84xf32>
    %cst_5 = arith.constant 0.000000e+00 : f32
    %6 = vector.broadcast %cst_5 : f32 to vector<2x84xf32>
    %7 = arith.maximumf %5, %6 : vector<2x84xf32>
    %8 = arith.truncf %7 : vector<2x84xf32> to vector<2x84xbf16>
    %c0_6 = arith.constant 0 : index
    %c0_7 = arith.constant 0 : index
    %9 = vector.load %arg4[%c0_6, %c0_7] : memref<84x128xbf16, #tpu.memory_space<vmem>>, vector<84x128xbf16>
    %cst_8 = arith.constant dense<0.000000e+00> : vector<2x128xf32>
    %10 = tpu.matmul %8, %9, %cst_8 {dimension_numbers = #tpu.dot_dimension_numbers<[1], [0], [0], [1], [0, 0, 1, 1], [], []>} : vector<2x84xbf16>, vector<84x128xbf16>, vector<2x128xf32> -> vector<2x128xf32>
    %c0_9 = arith.constant 0 : index
    %c0_10 = arith.constant 0 : index
    %11 = vector.load %arg5[%c0_9, %c0_10] : memref<1x128xf32, #tpu.memory_space<vmem>>, vector<1x128xf32>
    %12 = vector.broadcast %11 : vector<1x128xf32> to vector<2x128xf32>
    %13 = arith.addf %10, %12 : vector<2x128xf32>
    %cst_11 = arith.constant dense<0xFF800000> : vector<2xf32>
    %14 = vector.multi_reduction <maximumf>, %13, %cst_11 [1] : vector<2x128xf32> to vector<2xf32>
    %15 = vector.shape_cast %14 : vector<2xf32> to vector<2x1xf32>
    %16 = vector.broadcast %15 : vector<2x1xf32> to vector<2x128xf32>
    %17 = arith.subf %13, %16 : vector<2x128xf32>
    %18 = math.exp %17 : vector<2x128xf32>
    %cst_12 = arith.constant dense<0.000000e+00> : vector<2xf32>
    %19 = vector.multi_reduction <add>, %18, %cst_12 [1] : vector<2x128xf32> to vector<2xf32>
    %20 = vector.shape_cast %19 : vector<2xf32> to vector<2x1xf32>
    %21 = tpu.reciprocal %20 {approx = true} : vector<2x1xf32> -> vector<2x1xf32>
    %22 = vector.broadcast %21 : vector<2x1xf32> to vector<2x128xf32>
    %23 = arith.mulf %18, %22 : vector<2x128xf32>
    %c0_13 = arith.constant 0 : index
    %c0_14 = arith.constant 0 : index
    %24 = vector.load %arg6[%c0_13, %c0_14] : memref<2x128xf32, #tpu.memory_space<vmem>>, vector<2x128xf32>
    tpu.vector_store %arg6[%c0_13, %c0_14], %23 {strides = array<i32>} : memref<2x128xf32, #tpu.memory_space<vmem>>, vector<2x128xf32>,
    return
  }
  func.func @transform_0(%arg0: i32) -> (i32, i32) {
    %c0_i32 = arith.constant 0 : i32
    %c0_i32_0 = arith.constant 0 : i32
    return %arg0, %c0_i32 : i32, i32
  }
  func.func @transform_1(%arg0: i32) -> (i32, i32) {
    %c0_i32 = arith.constant 0 : i32
    %c0_i32_0 = arith.constant 0 : i32
    %c0_i32_1 = arith.constant 0 : i32
    return %c0_i32, %c0_i32_0 : i32, i32
  }
  func.func @transform_2(%arg0: i32) -> (i32, i32) {
    %c0_i32 = arith.constant 0 : i32
    %c0_i32_0 = arith.constant 0 : i32
    %c0_i32_1 = arith.constant 0 : i32
    return %c0_i32, %c0_i32_0 : i32, i32
  }
  func.func @transform_3(%arg0: i32) -> (i32, i32) {
    %c0_i32 = arith.constant 0 : i32
    %c0_i32_0 = arith.constant 0 : i32
    %c0_i32_1 = arith.constant 0 : i32
    return %c0_i32, %c0_i32_0 : i32, i32
  }
  func.func @transform_4(%arg0: i32) -> (i32, i32) {
    %c0_i32 = arith.constant 0 : i32
    %c0_i32_0 = arith.constant 0 : i32
    %c0_i32_1 = arith.constant 0 : i32
    return %c0_i32, %c0_i32_0 : i32, i32
  }
  func.func @transform_5(%arg0: i32) -> (i32, i32) {
    %c0_i32 = arith.constant 0 : i32
    %c0_i32_0 = arith.constant 0 : i32
    return %arg0, %c0_i32 : i32, i32
  }
}

</mosaic_0001>

<bundles_post_ra>
// kernel: tpu_custom_call.1
= control target key start
LH: loop header
LB: loop body
LE: loop exit
PB: predicated region body
PF: predicated region fallthrough
CT: control target
= control target key end

     0   :  { %v568_v2 = vmov 0.0   ;;  %vm569_vm0 = vmmov 0   ;;  %v80_v11 = vlaneseq  ;;  %vm211_vm1 = vcmask 1045504   ;;  %s714_s0 = inlined_call_operand.vmem [shape: bf16[2,300], index: 0, kind: input, shape index: {}]   ;;  %s715_s1 = inlined_call_operand.vmem [shape: bf16[300,84], index: 1, kind: input, shape index: {}]   ;;  %s716_s2 = inlined_call_operand.vmem [shape: f32[1,84], index: 2, kind: input, shape index: {}]   ;;  %s717_s3 = inlined_call_operand.vmem [shape: bf16[84,128], index: 3, kind: input, shape index: {}]   ;;  %s718_s4 = inlined_call_operand.vmem [shape: f32[1,128], index: 4, kind: input, shape index: {}]   ;;  %s719_s5 = inlined_call_operand.hbm [shape: f32[2,128], index: 5, kind: output, shape index: {}]  }
   0x1   :  { %v515_v0 = vld [vmem:[%s715_s1 + $0x40] sm:$0xff]   ;;  %485 = vmatprep.subr.bf16.mxu1 %v568_v2  ;;  %v517_v3 = vld [vmem:[%s715_s1 + $0x48] sm:$0xff]   ;;  %v519_v5 = vld [vmem:[%s715_s1 + $0x50] sm:$0xff]   ;;  %491 = vmatprep.mubr.msk.bf16.mxu1 %vm569_vm0, %v568_v2  ;;  %v570_v18 = vmov 1966171168  }
   0x2   :  { %v516_v1 = vld [vmem:[%s715_s1] sm:$0xff]   ;;  %452 = vmatprep.subr.bf16.mxu0 %v515_v0  ;;  %v518_v4 = vld [vmem:[%s715_s1 + $0x8] sm:$0xff]   ;;  %v520_v6 = vld [vmem:[%s715_s1 + $0x10] sm:$0xff]   ;;  %v81_v16 = vshrl.u32 %v80_v11, 7  ;;  %v78_v19 = vunpack.c.l.s4 %v570_v18 }
   0x3   :  { %453 = vmatpush3.bf16.msra.mxu0 %v516_v1  ;;  %v521_v7 = vld [vmem:[%s715_s1 + $0x58] sm:$0xff]   ;;  %v523_v9 = vld [vmem:[%s715_s1 + $0x60] sm:$0xff]   ;;  %v530_v13 = vld [vmem:[%s715_s1 + $0x88] sm:$0xff]  }
   0x4   :  { %454 = vmatprep.subr.bf16.mxu0 %v517_v3  ;;  %v522_v8 = vld [vmem:[%s715_s1 + $0x18] sm:$0xff]   ;;  %v527_v10 = vld [vmem:[%s715_s1 + $0x80] sm:$0xff]   ;;  %v525_v14 = vld [vmem:[%s715_s1 + $0x68] sm:$0xff]   ;;  %v79_v24 = vunpack.c.0.s8 %v78_v19 }
   0x5   :  { %v524_v12 = vld [vmem:[%s715_s1 + $0x20] sm:$0xff]   ;;  %486 = vmatpush3.bf16.msra.mxu1 %v527_v10  ;;  %v526_v15 = vld [vmem:[%s715_s1 + $0x28] sm:$0xff]   ;;  %v533_v20 = vld [vmem:[%s715_s1 + $0x90] sm:$0x3f]  }
   0x6   :  { %487 = vmatprep.subr.bf16.mxu1 %v568_v2  ;;  %v423_v17 = vld.sshfl [vmem:[%s714_s0] sm:$0x13 pattern:$0x75316420]  ;;  %v528_v21 = vld [vmem:[%s715_s1 + $0x70] sm:$0xff]   ;;  %v213_v25 = vsel %vm211_vm1, %v533_v20, 0  ;;  %v82_v27 = vsub.s32 %v79_v24, %v81_v16 }
   0x7   :  { %455 = vmatpush3.bf16.msra.mxu0 %v518_v4  ;;  %v529_v22 = vld [vmem:[%s715_s1 + $0x30] sm:$0xff]   ;;  %v76_v23 = vcombine.high %v423_v17, %v423_v17  ;;  %v531_v26 = vld [vmem:[%s715_s1 + $0x78] sm:$0xff]  }
   0x8   :  { %456 = vmatprep.subr.bf16.mxu0 %v519_v5 }
   0x9   :  { %488 = vmatpush3.bf16.msra.mxu1 %v530_v13 }
   0xa   :  { %489 = vmatprep.subr.bf16.mxu1 %v568_v2 }
   0xb   :  { %457 = vmatpush3.bf16.msra.mxu0 %v520_v6 }
   0xc   :  { %458 = vmatprep.subr.bf16.mxu0 %v521_v7 }
   0xd   :  { %490 = vmatpush3.bf16.msra.mxu1 %v213_v25 }
   0xe   :  { %495 = vmatprep.subr.bf16.mxu1 %v568_v2 }
   0xf   :  { %459 = vmatpush3.bf16.msra.mxu0 %v522_v8 }
  0x10   :  { %460 = vmatprep.subr.bf16.mxu0 %v523_v9 }
  0x13   :  { %461 = vmatpush3.bf16.msra.mxu0 %v524_v12 }
  0x14   :  { %462 = vmatprep.subr.bf16.mxu0 %v525_v14 }
  0x17   :  { %463 = vmatpush3.bf16.msra.mxu0 %v526_v15 }
  0x18   :  { %464 = vmatprep.subr.bf16.mxu0 %v528_v21 }
  0x19   :  { %10 = vsyncpa [#allocation3], 0  ;;  %v90_v28 = vrot.slane %v76_v23, %v82_v27  ;;  %v83_v29 = vrot.slane %v423_v17, %v82_v27  ;;  %vm207_vm2 = vcmask 359424   ;;  %v534_v30 = vld [vmem:[%s717_s3] sm:$0xff]   ;;  %v532_v31 = vld [vmem:[%s715_s1 + $0x38] sm:$0xff]   ;;  %vm352_vm3 = vcmask 1041408  }
  0x1a   :  { %v535_v33 = vld [vmem:[%s717_s3 + $0x8] sm:$0xff]   ;;  %v536_v34 = vld [vmem:[%s717_s3 + $0x10] sm:$0xff]   ;;  %v537_v35 = vld [vmem:[%s717_s3 + $0x18] sm:$0xff]   ;;  %vm348_vm4 = vcmask 687104  }
  0x1b   :  { %465 = vmatpush3.bf16.msra.mxu0 %v529_v22  ;;  %247 = vmatprep.mubr.bf16.mxu0 %v90_v28  ;;  %v91_v32 = vcombine.high %v83_v29, %v83_v29  ;;  %v538_v36 = vld [vmem:[%s717_s3 + $0x20] sm:$0xff]   ;;  %v539_v37 = vld [vmem:[%s717_s3 + $0x28] ss:$0 sps:$4 sm:$0x33]  }
  0x1c   :  { %466 = vmatprep.subr.bf16.mxu0 %v531_v26  ;;  %v354_v38 = vsel %vm352_vm3, %v539_v37, 0  ;;  %v422_v45 = vld [vmem:[%s716_s2] ss:$0 sm:$0xff]  ;;  %s571_s2 = smov [#allocation2]  }
  0x1d   :  { %492 = vmatmul.mubr.msk.bf16.vlgmr.msra.gmra.mrb[0].mxu1 %vm207_vm2, %v91_v32  ;;  %v444_v53 = vld [vmem:[%s718_s4] ss:$0 sm:$0xff]  ;;  %s414_s4 = sshll.u32 %s571_s2, 4  ;;  %s415_s4 = int_to_ptr.vmem [resolvable:$true] %s414_s4 }
  0x1e   :  { %496 = vmatpush3.bf16.msra.mxu1 %v534_v30  ;;  %507 = vmatprep.mubr.msk.bf16.mxu1 %vm569_vm0, %v568_v2  ;;  %s544_s21 = scalar_lea.vmem %s415_s4, 32  ;;  %p549_p1 = scmp.lt.s32.totalorder %s415_s4, %s415_s4 }
  0x1f   :  { %467 = vmatpush3.bf16.msra.mxu0 %v532_v31  ;;  %497 = vmatprep.subr.bf16.mxu1 %v568_v2  ;;  %p545_p0 = scmp.ne.s32.totalorder %s415_s4, %s544_s21  ;;  %p550_p2 = scmp.lt.s32.totalorder %s544_s21, %s544_s21 }
  0x21   :  { %p551_p3 = por %p550_p2, %p549_p1 }
  0x22   :  { %248 = vmatmul.mubr.bf16.vlgmr.msra.gmra.mrb[0].mxu0 %v83_v29  ;;  %498 = vmatpush3.bf16.msra.mxu1 %v535_v33 }
  0x23   :  { %499 = vmatprep.subr.bf16.mxu1 %v568_v2  ;;  %p552_p4 = pnand %p551_p3, %p545_p0 }
  0x26   :  { %500 = vmatpush3.bf16.msra.mxu1 %v536_v34 }
  0x27   :  { %501 = vmatprep.subr.bf16.mxu1 %v568_v2 }
  0x2a   :  { %502 = vmatpush3.bf16.msra.mxu1 %v537_v35 }
  0x2b   :  { %503 = vmatprep.subr.bf16.mxu1 %v568_v2 }
  0x2e   :  { %504 = vmatpush3.bf16.msra.mxu1 %v538_v36 }
  0x2f   :  { %505 = vmatprep.subr.bf16.mxu1 %v568_v2 }
  0x32   :  { %506 = vmatpush3.bf16.msra.mxu1 %v354_v38 }
  0xf0   :  { %v289_v39 = vpop.f32.mrb[0].mxu1 }
  0xf1   :  { %v493_v40 = vpop.f32.mrb[1].mxu1 }
  0xf2   :  { %v292_v41 = vpop.f32.mrb[2].mxu1 }
  0xf3   :  { %v494_v42 = vpop.f32.mrb[3].mxu1 }
  0xf5   :  { %v468_v43 = vpop.f32.mrb[0].mxu0 }
  0xf6   :  { %v469_v44 = vpop.f32.mrb[1].mxu0 }
  0xf7   :  { %v470_v46 = vadd.f32 %v469_v44, %v468_v43  ;;  %v471_v47 = vpop.f32.mrb[2].mxu0 }
  0xf8   :  { %v472_v48 = vpop.f32.mrb[3].mxu0 }
  0xf9   :  { %v250_v49 = vadd.f32 %v470_v46, %v422_v45 }
  0xfb   :  { %v290_v50 = vadd.f32 %v289_v39, %v250_v49 }
  0xfd   :  { %v295_v51 = vmax.f32 %v290_v50, 0.0 }
  0xff   :  { %v296_v52 = vpack.c.bf16 %v295_v51, %v295_v51 }
 0x101   :  { %508 = vmatmul.mubr.msk.bf16.vlgmr.msra.gmra.mrb[4].mxu1 %vm348_vm4, %v296_v52 }
 0x1d4   :  { %v390_v54 = vpop.f32.mrb[4].mxu1 }
 0x1d5   :  { %v391_v55 = vadd.f32 %v444_v53, %v390_v54  ;;  %v509_v56 = vpop.f32.mrb[5].mxu1 }
 0x1d6   :  { %v393_v57 = vpop.f32.mrb[6].mxu1 }
 0x1d7   :  { %v510_v58 = vpop.f32.mrb[7].mxu1  ;;  %v396_v59 = vsel %vm352_vm3, %v391_v55, -inf }
 0x1d8   :  { %397 = vmax.xlane.f32.xlu0 %v396_v59 }
 0x265   :  { %v398_v60 = vpop.xlane.xlu0 %397 }
 0x266   :  { %v399_v61 = vsub.f32 %v391_v55, %v398_v60 }
 0x268   :  { %v400_v62 = vmul.f32 1.442695, %v399_v61 }
 0x26a   :  { %540 = vpow2.f32 %v400_v62 }
 0x274   :  { %v541_v63 = vpop.eup %540 }
 0x275   :  { %v402_v0 = vsel %vm352_vm3, %v541_v63, 0.0 }
 0x276   :  { %403 = vadd.xlane.f32.xlu0 %v402_v0 }
 0x303   :  { %v404_v1 = vpop.xlane.xlu0 %403 }
 0x304   :  { %542 = vrcp.f32 %v404_v1 }
 0x30e   :  { %v543_v2 = vpop.eup %542 }
 0x30f   :  { %v406_v3 = vmul.f32 %v543_v2, %v541_v63 }
 0x311   :  { %407 = vst [vmem:[#allocation2] sm:$0x3] %v406_v3 }
 0x312   :  { %555 = shalt.err (!%p552_p4)
}
 0x313   :  { %s556_s24 = scalar_lea.hbm %s719_s5, 32 }
 0x314   :  { %p557_p5 = scmp.ne.s32.totalorder %s719_s5, %s556_s24  ;;  %p560_p6 = scmp.lt.u32.totalorder %s556_s24, %s719_s5 }
 0x316   :  { %p562_p7 = pnand %p560_p6, %p557_p5 }
 0x318   :  { %565 = shalt.err (!%p562_p7)
}
 0x319   :  { %417 = dma.vmem_to_hbm [thread:$0]  %s415_s4, 32, %s719_s5, [#allocation3]  }
 0x31a   :  { %566 = dma.done.wait [#allocation3], 32  }
 0x31b   :  { %567 = vsyncadd [#allocation3], 4294967264 }
 0x31c   :  { %421 = vsyncpa [#allocation3], 1 }

</bundles_post_ra>
